<compile_context>
chip_gen: v7x
topology: tpu7x:2x2x1
jax: 0.10.0
libtpu: 0.0.40
codegen_flags: <defaults>
</compile_context>

<pallas_src>
import functools

import numpy as np
import jax
import jax.numpy as jnp
from jax import lax
from jax.experimental import pallas as pl
from jax.experimental.pallas import tpu as pltpu


def _round_up(x, m):
    return ((x + m - 1) // m) * m


# -----------------------------------------------------------------------------
# Feature library: degree-2 polynomial with bias (the standard SINDy default).
# TODO(synk): the PyTorch module accepts an arbitrary user-supplied
# `feature_library`; only the common polynomial(degree=2, include_bias=True)
# library is implemented here.
# -----------------------------------------------------------------------------
def feature_number(d, degree=2, include_bias=True):
    nf = d
    if degree >= 2:
        nf += (d * (d + 1)) // 2
    if include_bias:
        nf += 1
    return nf


def polynomial_features(z, degree=2, include_bias=True):
    """Pure-JAX reference: (B, d) -> (B, nf), columns [1, z_i, z_i*z_j (i<=j)]."""
    b, d = z.shape
    feats = []
    if include_bias:
        feats.append(jnp.ones((b, 1), z.dtype))
    feats.append(z)
    if degree >= 2:
        ii, jj = jnp.triu_indices(d)
        feats.append(z[:, ii] * z[:, jj])
    return jnp.concatenate(feats, axis=1)


def _selection_matrices(d, degree=2, include_bias=True):
    """Static 0/1 matrices P, Q with Theta = (z1 @ P) * (z1 @ Q), z1 = [1 | z].

    Every polynomial-library column (bias, linear, quadratic) is a product of
    two columns of z1, so two trivially small selection matmuls plus a Hadamard
    product build Theta with only aligned MXU/VPU ops inside the kernel.
    """
    nf = feature_number(d, degree, include_bias)
    P = np.zeros((d + 1, nf), np.float32)
    Q = np.zeros((d + 1, nf), np.float32)
    c = 0
    if include_bias:            # 1 * 1
        P[0, c] = 1.0
        Q[0, c] = 1.0
        c += 1
    for i in range(d):          # 1 * z_i
        P[0, c] = 1.0
        Q[i + 1, c] = 1.0
        c += 1
    if degree >= 2:             # z_i * z_j, i <= j  (triu order, matches ref)
        for i in range(d):
            for j in range(i, d):
                P[i + 1, c] = 1.0
                Q[j + 1, c] = 1.0
                c += 1
    assert c == nf
    return jnp.asarray(P), jnp.asarray(Q)


# -----------------------------------------------------------------------------
# Fused Pallas kernel: feature library + batch_rms partials + Linear per tile.
# -----------------------------------------------------------------------------
def _fused_kernel(z1_ref, p_ref, q_ref, w_ref, y_ref, rms_ref, *,
                  batch, tm, mxu_dtype):
    i = pl.program_id(0)
    z1 = z1_ref[...].astype(jnp.float32)                       # (tm, d+1)

    # Feature library on-chip: Theta = (z1 @ P) * (z1 @ Q)      -> (tm, nf)
    left = jnp.dot(z1, p_ref[...], preferred_element_type=jnp.float32)
    right = jnp.dot(z1, q_ref[...], preferred_element_type=jnp.float32)
    theta = left * right

    # Ragged last batch tile: zero rows past the real batch size (no padding
    # in the wrapper; out-of-bounds input rows hold undefined VMEM data).
    if batch % tm != 0:
        row = lax.broadcasted_iota(jnp.int32, theta.shape, 0)
        theta = jnp.where(i * tm + row < batch, theta, 0.0)

    # batch_rms partial: per-tile sum(Theta^2) over rows, reduced outside so
    # the batch grid axis can stay "parallel".
    rms_ref[...] = jnp.sum(theta * theta, axis=0, keepdims=True)[None]

    # The Linear: y = Theta @ W^T. W is in native (nx, nf) layout; contract the
    # last dim of both operands on the MXU with f32 accumulation.
    lhs = theta if mxu_dtype is None else theta.astype(mxu_dtype)
    rhs = w_ref[...] if mxu_dtype is None else w_ref[...].astype(mxu_dtype)
    y = lax.dot_general(lhs, rhs, (((1,), (1,)), ((), ())),
                        preferred_element_type=jnp.float32)
    y_ref[...] = y.astype(y_ref.dtype)


# -----------------------------------------------------------------------------
# Pure-JAX reference (also the tiny-problem escape hatch).
# -----------------------------------------------------------------------------
def _reference_forward(x, u, W, *, degree=2, include_bias=True):
    z = jnp.hstack((x, jnp.reshape(u, (u.shape[-1], 1))))
    Theta = polynomial_features(z, degree, include_bias)
    batch_rms = None
    if Theta.shape[0] != 1:
        batch_rms = jnp.sqrt(jnp.mean(Theta ** 2, axis=0))
    return Theta @ W.T, batch_rms


# -----------------------------------------------------------------------------
# Full forward pass matching simple_Linear.forward(x, u).
# -----------------------------------------------------------------------------
def simple_linear_forward(x, u, W, *, degree=2, include_bias=True,
                          block_rows=512, mxu_dtype=None, use_pallas=True):
    """x: (B, nx), u: (B,), W: (nx, nf). Returns (y, batch_rms).

    batch_rms is None when B == 1, matching the module's
    `if Theta.shape[0] != 1` guard. Set mxu_dtype=jnp.bfloat16 to trade a
    little accuracy for native MXU rate / half the VMEM matmul traffic
    (accumulation stays f32). use_pallas=False falls back to plain XLA, which
    is faster for very small batches where pallas_call dispatch dominates.
    """
    B, nx = x.shape
    assert u.ndim == 1 and u.shape[0] == B, "u must be 1-D with one entry per batch row"
    d = nx + 1
    nf = feature_number(d, degree, include_bias)
    assert W.shape == (nx, nf), (W.shape, (nx, nf))

    if not use_pallas:
        return _reference_forward(x, u, W, degree=degree, include_bias=include_bias)

    # z1 = [1 | x | u]: a tiny (B, d+1) concat; everything else fuses in-kernel.
    z1 = jnp.concatenate(
        [jnp.ones((B, 1), x.dtype), x, u[:, None].astype(x.dtype)], axis=1)
    P, Q = _selection_matrices(d, degree, include_bias)

    # Only the batch axis is tiled; feature/output dims use full-dim blocks.
    tm = max(8, min(block_rows, _round_up(B, 8)))
    grid_m = pl.cdiv(B, tm)

    kernel = functools.partial(_fused_kernel, batch=B, tm=tm, mxu_dtype=mxu_dtype)

    y, rms_part = pl.pallas_call(
        kernel,
        out_shape=(jax.ShapeDtypeStruct((B, nx), x.dtype),
                   jax.ShapeDtypeStruct((grid_m, 1, nf), jnp.float32)),
        grid_spec=pltpu.PrefetchScalarGridSpec(
            num_scalar_prefetch=0,
            grid=(grid_m,),
            in_specs=[
                pl.BlockSpec((tm, d + 1), lambda i: (i, 0)),    # z1 row tile
                pl.BlockSpec((d + 1, nf), lambda i: (0, 0)),    # P (resident)
                pl.BlockSpec((d + 1, nf), lambda i: (0, 0)),    # Q (resident)
                pl.BlockSpec((nx, nf), lambda i: (0, 0)),       # W (native layout)
            ],
            out_specs=(
                pl.BlockSpec((tm, nx), lambda i: (i, 0)),       # y row tile
                pl.BlockSpec((1, 1, nf), lambda i: (i, 0, 0)),  # per-tile sum(Theta^2)
            ),
        ),
        compiler_params=pltpu.CompilerParams(
            # Batch tiles are independent -> parallel (feeds both v7x TCs).
            dimension_semantics=("parallel",),
        ),
    )(z1, P, Q, W)

    batch_rms = None
    if B != 1:
        # Tiny (grid_m, nf) reduction in XLA; keeps the kernel grid parallel.
        batch_rms = jnp.sqrt(jnp.sum(rms_part[:, 0, :], axis=0) / B)
    return y, batch_rms


if __name__ == "__main__":
    key = jax.random.PRNGKey(0)
    kx, ku, kw = jax.random.split(key, 3)

    batch, nx = 8, 4                 # small shapes consistent with the module
    d = nx + 1                       # state + single control column
    nf = feature_number(d)           # 1 + 5 + 15 = 21

    x = jax.random.normal(kx, (batch, nx), dtype=jnp.float32)
    u = jax.random.normal(ku, (batch,), dtype=jnp.float32)
    W = 0.1 * jax.random.normal(kw, (nx, nf), dtype=jnp.float32)

    y, batch_rms = simple_linear_forward(x, u, W)
    y = jax.block_until_ready(y)

    # Pure-JAX reference of the same forward.
    y_ref, rms_ref = _reference_forward(x, u, W)

    assert y.shape == (batch, nx) and y.dtype == jnp.float32
    assert bool(jnp.allclose(y, y_ref, atol=1e-5, rtol=1e-5))
    assert bool(jnp.allclose(batch_rms, rms_ref, atol=1e-5, rtol=1e-5))
    print("KERNEL_OK")
</pallas_src>

<mosaic_0001>
module attributes {stable_mosaic.version = 11 : i64} {
  func.func @_fused_kernel(%arg0: i32, %arg1: memref<8x6xf32, #tpu.memory_space<vmem>>, %arg2: memref<6x21xf32, #tpu.memory_space<vmem>>, %arg3: memref<6x21xf32, #tpu.memory_space<vmem>>, %arg4: memref<4x21xf32, #tpu.memory_space<vmem>>, %arg5: memref<8x4xf32, #tpu.memory_space<vmem>>, %arg6: memref<1x1x21xf32, #tpu.memory_space<vmem>>) attributes {dimension_semantics = [#tpu.dimension_semantics<parallel>], iteration_bounds = array<i64: 1>, scalar_prefetch = 0 : i64, scratch_operands = 0 : i64, tpu.core_type = #tpu.core_type<tc>, window_params = [{transform_indices = @transform_0, window_bounds = array<i64: 8, 6>}, {pipeline_mode = #tpu.pipeline_mode<synchronous>, transform_indices = @transform_1, window_bounds = array<i64: 6, 21>}, {pipeline_mode = #tpu.pipeline_mode<synchronous>, transform_indices = @transform_2, window_bounds = array<i64: 6, 21>}, {pipeline_mode = #tpu.pipeline_mode<synchronous>, transform_indices = @transform_3, window_bounds = array<i64: 4, 21>}, {transform_indices = @transform_4, window_bounds = array<i64: 8, 4>}, {transform_indices = @transform_5, window_bounds = array<i64: 1, 1, 21>}]} {
    %c0 = arith.constant 0 : index
    %c0_0 = arith.constant 0 : index
    %0 = vector.load %arg1[%c0, %c0_0] : memref<8x6xf32, #tpu.memory_space<vmem>>, vector<8x6xf32>
    %c0_1 = arith.constant 0 : index
    %c0_2 = arith.constant 0 : index
    %1 = vector.load %arg2[%c0_1, %c0_2] : memref<6x21xf32, #tpu.memory_space<vmem>>, vector<6x21xf32>
    %cst = arith.constant dense<0.000000e+00> : vector<8x21xf32>
    %2 = tpu.matmul %0, %1, %cst {dimension_numbers = #tpu.dot_dimension_numbers<[1], [0], [0], [1], [0, 0, 1, 1], [], []>} : vector<8x6xf32>, vector<6x21xf32>, vector<8x21xf32> -> vector<8x21xf32>
    %c0_3 = arith.constant 0 : index
    %c0_4 = arith.constant 0 : index
    %3 = vector.load %arg3[%c0_3, %c0_4] : memref<6x21xf32, #tpu.memory_space<vmem>>, vector<6x21xf32>
    %cst_5 = arith.constant dense<0.000000e+00> : vector<8x21xf32>
    %4 = tpu.matmul %0, %3, %cst_5 {dimension_numbers = #tpu.dot_dimension_numbers<[1], [0], [0], [1], [0, 0, 1, 1], [], []>} : vector<8x6xf32>, vector<6x21xf32>, vector<8x21xf32> -> vector<8x21xf32>
    %5 = arith.mulf %2, %4 : vector<8x21xf32>
    %6 = arith.mulf %5, %5 : vector<8x21xf32>
    %cst_6 = arith.constant dense<0.000000e+00> : vector<21xf32>
    %7 = vector.multi_reduction <add>, %6, %cst_6 [0] : vector<8x21xf32> to vector<21xf32>
    %8 = vector.shape_cast %7 : vector<21xf32> to vector<1x21xf32>
    %9 = vector.shape_cast %8 : vector<1x21xf32> to vector<1x1x21xf32>
    %c0_7 = arith.constant 0 : index
    %c0_8 = arith.constant 0 : index
    %c0_9 = arith.constant 0 : index
    %10 = vector.load %arg6[%c0_7, %c0_8, %c0_9] : memref<1x1x21xf32, #tpu.memory_space<vmem>>, vector<1x1x21xf32>
    tpu.vector_store %arg6[%c0_7, %c0_8, %c0_9], %9 {strides = array<i32>} : memref<1x1x21xf32, #tpu.memory_space<vmem>>, vector<1x1x21xf32>,
    %c0_10 = arith.constant 0 : index
    %c0_11 = arith.constant 0 : index
    %11 = vector.load %arg4[%c0_10, %c0_11] : memref<4x21xf32, #tpu.memory_space<vmem>>, vector<4x21xf32>
    %cst_12 = arith.constant dense<0.000000e+00> : vector<8x4xf32>
    %12 = tpu.matmul %5, %11, %cst_12 {dimension_numbers = #tpu.dot_dimension_numbers<[1], [1], [0], [0], [0, 0, 1, 0], [], []>} : vector<8x21xf32>, vector<4x21xf32>, vector<8x4xf32> -> vector<8x4xf32>
    %c0_13 = arith.constant 0 : index
    %c0_14 = arith.constant 0 : index
    %13 = vector.load %arg5[%c0_13, %c0_14] : memref<8x4xf32, #tpu.memory_space<vmem>>, vector<8x4xf32>
    tpu.vector_store %arg5[%c0_13, %c0_14], %12 {strides = array<i32>} : memref<8x4xf32, #tpu.memory_space<vmem>>, vector<8x4xf32>,
    return
  }
  func.func @transform_0(%arg0: i32) -> (i32, i32) {
    %c0_i32 = arith.constant 0 : i32
    %c0_i32_0 = arith.constant 0 : i32
    return %arg0, %c0_i32 : i32, i32
  }
  func.func @transform_1(%arg0: i32) -> (i32, i32) {
    %c0_i32 = arith.constant 0 : i32
    %c0_i32_0 = arith.constant 0 : i32
    %c0_i32_1 = arith.constant 0 : i32
    return %c0_i32, %c0_i32_0 : i32, i32
  }
  func.func @transform_2(%arg0: i32) -> (i32, i32) {
    %c0_i32 = arith.constant 0 : i32
    %c0_i32_0 = arith.constant 0 : i32
    %c0_i32_1 = arith.constant 0 : i32
    return %c0_i32, %c0_i32_0 : i32, i32
  }
  func.func @transform_3(%arg0: i32) -> (i32, i32) {
    %c0_i32 = arith.constant 0 : i32
    %c0_i32_0 = arith.constant 0 : i32
    %c0_i32_1 = arith.constant 0 : i32
    return %c0_i32, %c0_i32_0 : i32, i32
  }
  func.func @transform_4(%arg0: i32) -> (i32, i32) {
    %c0_i32 = arith.constant 0 : i32
    %c0_i32_0 = arith.constant 0 : i32
    return %arg0, %c0_i32 : i32, i32
  }
  func.func @transform_5(%arg0: i32) -> (i32, i32, i32) {
    %c0_i32 = arith.constant 0 : i32
    %c0_i32_0 = arith.constant 0 : i32
    %c0_i32_1 = arith.constant 0 : i32
    return %arg0, %c0_i32, %c0_i32_0 : i32, i32, i32
  }
}

</mosaic_0001>

<bundles_post_ra>
// kernel: tpu_custom_call.1
= control target key start
LH: loop header
LB: loop body
LE: loop exit
PB: predicated region body
PF: predicated region fallthrough
CT: control target
= control target key end

     0   :  { %11 = vsyncpa [#allocation3], 0  ;;  %s537_s0 = inlined_call_operand.hbm [shape: f32[8,6], index: 0, kind: input, shape index: {}]   ;;  %s538_s1 = inlined_call_operand.hbm [shape: f32[6,21], index: 1, kind: input, shape index: {}]   ;;  %s539_s2 = inlined_call_operand.hbm [shape: f32[6,21], index: 2, kind: input, shape index: {}]   ;;  %s540_s3 = inlined_call_operand.vmem [shape: f32[4,21], index: 3, kind: input, shape index: {}]   ;;  %s541_s4 = inlined_call_operand.vmem [shape: f32[8,4], index: 4, kind: output, shape index: {0}]   ;;  %s542_s5 = inlined_call_operand.hbm [shape: f32[1,1,21], index: 5, kind: output, shape index: {1}]  }
   0x1   :  { %12 = vsyncpa [#allocation6], 0 }
   0x2   :  { %13 = vsyncpa [#allocation4], 0  ;;  %s447_s18 = smov [#allocation5]   ;;  %s448_s20 = smov [#allocation2]  }
   0x3   :  { %s30_s19 = sshll.u32 %s447_s18, 4  ;;  %s20_s21 = sshll.u32 %s448_s20, 4  ;;  %s31_s19 = int_to_ptr.vmem [resolvable:$true] %s30_s19  ;;  %s21_s21 = int_to_ptr.vmem [resolvable:$true] %s20_s21 }
   0x4   :  { %s353_s24 = scalar_lea.hbm %s538_s1, 128 }
   0x5   :  { %p354_p0 = scmp.ne.s32.totalorder %s538_s1, %s353_s24  ;;  %p357_p1 = scmp.lt.u32.totalorder %s353_s24, %s538_s1 }
   0x7   :  { %p359_p2 = pnand %p357_p1, %p354_p0 }
   0x9   :  { %362 = shalt.err (!%p359_p2)
}
   0xa   :  { %s363_s29 = scalar_lea.vmem %s31_s19, 128  ;;  %p368_p4 = scmp.lt.s32.totalorder %s31_s19, %s31_s19 }
   0xb   :  { %p364_p3 = scmp.ne.s32.totalorder %s31_s19, %s363_s29  ;;  %p369_p5 = scmp.lt.s32.totalorder %s363_s29, %s363_s29 }
   0xd   :  { %p370_p6 = por %p369_p5, %p368_p4 }
   0xf   :  { %p371_p7 = pnand %p370_p6, %p364_p3 }
  0x11   :  { %374 = shalt.err (!%p371_p7)
}
  0x12   :  { %33 = dma.hbm_to_vmem [thread:$0]  %s538_s1, 128, %s31_s19, [#allocation6]  }
  0x13   :  { %s375_s9 = scalar_lea.hbm %s537_s0, 128 }
  0x14   :  { %p376_p8 = scmp.ne.s32.totalorder %s537_s0, %s375_s9  ;;  %p379_p9 = scmp.lt.u32.totalorder %s375_s9, %s537_s0 }
  0x16   :  { %p381_p10 = pnand %p379_p9, %p376_p8 }
  0x18   :  { %384 = shalt.err (!%p381_p10)
}
  0x19   :  { %s385_s14 = scalar_lea.vmem %s21_s21, 128  ;;  %p390_p12 = scmp.lt.s32.totalorder %s21_s21, %s21_s21 }
  0x1a   :  { %p386_p11 = scmp.ne.s32.totalorder %s21_s21, %s385_s14  ;;  %p391_p13 = scmp.lt.s32.totalorder %s385_s14, %s385_s14 }
  0x1c   :  { %p392_p0 = por %p391_p13, %p390_p12 }
  0x1e   :  { %p393_p1 = pnand %p392_p0, %p386_p11 }
  0x20   :  { %396 = shalt.err (!%p393_p1)
}
  0x21   :  { %23 = dma.hbm_to_vmem [thread:$0]  %s537_s0, 128, %s21_s21, [#allocation3]  }
  0x22   :  { %s449_s16 = smov [#allocation7]   ;;  %s397_s20 = scalar_lea.hbm %s539_s2, 128 }
  0x23   :  { %s40_s17 = sshll.u32 %s449_s16, 4  ;;  %p398_p2 = scmp.ne.s32.totalorder %s539_s2, %s397_s20  ;;  %s41_s17 = int_to_ptr.vmem [resolvable:$true] %s40_s17 }
  0x24   :  { %p401_p3 = scmp.lt.u32.totalorder %s397_s20, %s539_s2 }
  0x26   :  { %p403_p4 = pnand %p401_p3, %p398_p2 }
  0x28   :  { %406 = shalt.err (!%p403_p4)
}
  0x29   :  { %s407_s26 = scalar_lea.vmem %s41_s17, 128  ;;  %p412_p6 = scmp.lt.s32.totalorder %s41_s17, %s41_s17 }
  0x2a   :  { %p408_p5 = scmp.ne.s32.totalorder %s41_s17, %s407_s26  ;;  %p413_p7 = scmp.lt.s32.totalorder %s407_s26, %s407_s26 }
  0x2c   :  { %p414_p8 = por %p413_p7, %p412_p6 }
  0x2e   :  { %p415_p9 = pnand %p414_p8, %p408_p5 }
  0x30   :  { %418 = shalt.err (!%p415_p9)
}
  0x31   :  { %43 = dma.hbm_to_vmem [thread:$0]  %s539_s2, 128, %s41_s17, [#allocation6]  }
  0x32   :  { %441 = dma.done.wait [#allocation3], 128  }
  0x33   :  { %442 = vsyncadd [#allocation3], 4294967168 }
  0x34   :  { %443 = dma.done.wait [#allocation6], 256  }
  0x35   :  { %444 = vsyncadd [#allocation6], 4294967040  ;;  %v450_v0 = vmov 0.0   ;;  %vm451_vm0 = vmmov 0   ;;  %vm61_vm1 = vcmask 1045504   ;;  %vm57_vm2 = vcmask 48128  }
  0x36   :  { %332 = vmatprep.subr.mxu0 %v450_v0  ;;  %337 = vmatprep.subr.mxu1 %v450_v0  ;;  %v56_v1 = vld [vmem:[#allocation5] sm:$0x3f]  ;;  %v135_v2 = vld [vmem:[#allocation7] sm:$0x3f]  ;;  %v55_v3 = vld [vmem:[#allocation2] sm:$0xff]  ;;  %vm211_vm3 = vcmask 171008  }
  0x37   :  { %334 = vmatprep.mubr.msk.f32.mxu0 %vm451_vm0, %v450_v0  ;;  %339 = vmatprep.mubr.msk.f32.mxu1 %vm451_vm0, %v450_v0  ;;  %v221_v4 = vld [vmem:[%s540_s3] sm:$0xf]  ;;  %vm219_vm4 = vcmask 163840   ;;  %s452_s28 = smov [#allocation8]  }
  0x38   :  { %333 = vmatpush3.msk.msra.mxu0 %vm61_vm1, %v56_v1  ;;  %338 = vmatpush3.msk.msra.mxu1 %vm61_vm1, %v135_v2  ;;  %s308_s29 = sshll.u32 %s452_s28, 4  ;;  %s309_s29 = int_to_ptr.vmem [resolvable:$true] %s308_s29 }
  0x39   :  { %335 = vmatmul.mubr.msk.f32.vlgmr.msra.gmra.mrb[0].mxu0 %vm57_vm2, %v55_v3  ;;  %340 = vmatmul.mubr.msk.f32.vlgmr.msra.gmra.mrb[0].mxu1 %vm57_vm2, %v55_v3  ;;  %s419_s3 = scalar_lea.vmem %s309_s29, 16  ;;  %s423_s30 = scalar_lea.vmem %s309_s29, 32 }
  0x3a   :  { %342 = vmatprep.subr.mxu0 %v450_v0  ;;  %344 = vmatprep.mubr.msk.f32.mxu0 %vm451_vm0, %v450_v0  ;;  %p420_p10 = scmp.ne.s32.totalorder %s309_s29, %s419_s3  ;;  %p424_p11 = scmp.lt.s32.totalorder %s309_s29, %s309_s29 }
  0x3b   :  { %p425_p12 = scmp.lt.s32.totalorder %s423_s30, %s419_s3 }
  0x3d   :  { %p426_p13 = por %p425_p12, %p424_p11 }
  0x3f   :  { %343 = vmatpush3.xpose.msk.msra.mxu0 %vm211_vm3, %v221_v4  ;;  %p427_p0 = pnand %p426_p13, %p420_p10 }
 0x10c   :  { %v131_v5 = vpop.f32.mrb[0].mxu0  ;;  %v205_v6 = vpop.f32.mrb[0].mxu1 }
 0x10d   :  { %v209_v7 = vmul.f32 %v205_v6, %v131_v5  ;;  %v336_v8 = vpop.f32.mrb[1].mxu0  ;;  %v341_v9 = vpop.f32.mrb[1].mxu1 }
 0x10f   :  { %v210_v10 = vmul.f32 %v209_v7, %v209_v7  ;;  %345 = vmatmul.mubr.msk.f32.vlgmr.msra.gmra.mrb[2].mxu0 %vm211_vm3, %v209_v7 }
 0x111   :  { %v212_v11 = vsel %vm211_vm3, %v210_v10, 0.0 }
 0x112   :  { %v213_v12 = vrot.slane %v212_v11, 4 }
 0x114   :  { %v214_v13 = vadd.f32 %v213_v12, %v212_v11 }
 0x116   :  { %v215_v14 = vrot.slane %v214_v13, 2 }
 0x118   :  { %v216_v15 = vadd.f32 %v215_v14, %v214_v13 }
 0x11a   :  { %v217_v16 = vrot.slane %v216_v15, 1 }
 0x11c   :  { %v218_v17 = vadd.f32 %v217_v16, %v216_v15 }
 0x11e   :  { %220 = vst.msk [vmem:[#allocation8] sm:$0x1] %vm219_vm4, %v218_v17 }
 0x11f   :  { %430 = shalt.err (!%p427_p0)
}
 0x120   :  { %s431_s8 = scalar_lea.hbm %s542_s5, 16 }
 0x121   :  { %p432_p1 = scmp.ne.s32.totalorder %s542_s5, %s431_s8  ;;  %p435_p2 = scmp.lt.u32.totalorder %s431_s8, %s542_s5 }
 0x123   :  { %p437_p3 = pnand %p435_p2, %p432_p1 }
 0x125   :  { %440 = shalt.err (!%p437_p3)
}
 0x126   :  { %311 = dma.vmem_to_hbm [thread:$0]  %s309_s29, 16, %s542_s5, [#allocation4]   ;;  %vm298_vm5 = vcmask 31744  }
 0x1e2   :  { %v294_v18 = vpop.f32.mrb[2].mxu0 }
 0x1e3   :  { %299 = vst.msk [vmem:[%s541_s4] sm:$0xff] %vm298_vm5, %v294_v18  ;;  %v346_v19 = vpop.f32.mrb[3].mxu0 }
 0x1e4   :  { %445 = dma.done.wait [#allocation4], 16  }
 0x1e5   :  { %446 = vsyncadd [#allocation4], 4294967280 }
 0x1e6   :  { %317 = vsyncpa [#allocation3], 1 }
 0x1e7   :  { %318 = vsyncpa [#allocation6], 1 }
 0x1e8   :  { %319 = vsyncpa [#allocation4], 1 }

</bundles_post_ra>
